<compile_context>
chip_gen: v7x
topology: tpu7x:2x2x1
jax: 0.10.0
libtpu: 0.0.40
codegen_flags: <defaults>
</compile_context>

<pallas_src>
import functools

import jax
import jax.numpy as jnp
from jax.experimental import pallas as pl
from jax.experimental.pallas import tpu as pltpu

H1 = 256          # per-branch hidden 1
H2 = 128          # per-branch hidden 2
H1_CAT = 2 * H1   # 512  (fused layer-1 output width)
H2_CAT = 2 * H2   # 256  (fused layer-2 output width)
OUT_PAD = 128     # lane-padded fused output width (>= a_dim + 1)


def a3c_fused_kernel(x_ref, w1_ref, w2_ref, w3_ref, b_ref, out_ref, *, a_dim):
    """Fused two-branch MLP forward; every operand resident in VMEM."""
    # Static, 128-lane-aligned slices of the f32 bias slab.
    b1 = b_ref[:, 0:H1_CAT]                       # (1, 512)
    b2 = b_ref[:, H1_CAT:H1_CAT + H2_CAT]         # (1, 256)
    b3 = b_ref[:, H1_CAT + H2_CAT:]               # (1, 128)

    x = x_ref[...]                                # (B, s_dim) bf16

    # 3 fused matmuls, f32 accumulation, bf16 operands.
    h1 = jnp.dot(x, w1_ref[...], preferred_element_type=jnp.float32) + b1
    h1 = jnp.maximum(h1, 0.0).astype(w2_ref.dtype)

    h2 = jnp.dot(h1, w2_ref[...], preferred_element_type=jnp.float32) + b2
    h2 = jnp.maximum(h2, 0.0).astype(w3_ref.dtype)

    pre = jnp.dot(h2, w3_ref[...], preferred_element_type=jnp.float32) + b3
    # lanes [0, a_dim): policy logits; lane a_dim: value; lanes a_dim+1..: 0.

    lane = jax.lax.broadcasted_iota(jnp.int32, pre.shape, dimension=1)
    is_pi = lane < a_dim

    # Masked softmax over the policy lanes only (value/pad lanes -> -inf -> 0).
    masked = jnp.where(is_pi, pre, -jnp.inf)
    m = jnp.max(masked, axis=-1, keepdims=True)
    e = jnp.exp(masked - m)
    denom = jnp.sum(e, axis=-1, keepdims=True)
    probs = e * pl.reciprocal(denom, approx=True)     # EUP slot, ~free

    # One lane-dense (B, 128) store: probs | value | zeros.
    out_ref[...] = jnp.where(is_pi, probs, pre).astype(out_ref.dtype)


def pack_params(params, a_dim):
    """One-time host-side fusion of the six Linear layers into 3 bf16 weight
    matrices plus a single f32 bias slab."""
    assert a_dim + 1 <= OUT_PAD

    w1 = jnp.concatenate([params["wpi1"], params["wv1"]], axis=1)      # (s_dim, 512)
    b1 = jnp.concatenate([params["bpi1"], params["bv1"]], axis=1)      # (1, 512)

    w2 = jnp.zeros((H1_CAT, H2_CAT), jnp.float32)                      # block-diag (512, 256)
    w2 = w2.at[:H1, :H2].set(params["wpi2"])
    w2 = w2.at[H1:, H2:].set(params["wv2"])
    b2 = jnp.concatenate([params["bpi2"], params["bv2"]], axis=1)      # (1, 256)

    w3 = jnp.zeros((H2_CAT, OUT_PAD), jnp.float32)                     # block-diag, lane-padded
    w3 = w3.at[:H2, :a_dim].set(params["wpi3"])
    w3 = w3.at[H2:, a_dim:a_dim + 1].set(params["wv3"])
    b3 = jnp.zeros((1, OUT_PAD), jnp.float32)
    b3 = b3.at[:, :a_dim].set(params["bpi3"])
    b3 = b3.at[:, a_dim:a_dim + 1].set(params["bv3"])

    return {
        "w1": w1.astype(jnp.bfloat16),
        "w2": w2.astype(jnp.bfloat16),
        "w3": w3.astype(jnp.bfloat16),
        "bias": jnp.concatenate([b1, b2, b3], axis=1),                 # (1, 896) f32
        "a_dim": a_dim,
    }


def a3c_forward(x, packed):
    """x: (B, s_dim) float32. packed: output of pack_params. Returns (values, probs)."""
    B = x.shape[0]
    a_dim = packed["a_dim"]
    vmem = pl.BlockSpec(memory_space=pltpu.VMEM)

    out = pl.pallas_call(
        functools.partial(a3c_fused_kernel, a_dim=a_dim),
        out_shape=jax.ShapeDtypeStruct((B, OUT_PAD), jnp.float32),
        in_specs=[vmem] * 5,
        out_specs=vmem,
    )(x.astype(jnp.bfloat16), packed["w1"], packed["w2"], packed["w3"],
      packed["bias"])

    # Free layout plumbing: split the lane-dense slab.
    logits = out[:, :a_dim]               # softmax probabilities ("logits" name kept from the PyTorch module)
    values = out[:, a_dim:a_dim + 1]
    return values, logits


def init_params(key, s_dim, a_dim):
    """PyTorch nn.Linear-style init U(-1/sqrt(in), 1/sqrt(in)); weights stored
    as (in_features, out_features)."""
    dims = {
        "pi1": (s_dim, 256), "pi2": (256, 128), "pi3": (128, a_dim),
        "v1": (s_dim, 256), "v2": (256, 128), "v3": (128, 1),
    }
    params = {}
    for name, (fin, fout) in dims.items():
        key, kw, kb = jax.random.split(key, 3)
        bound = 1.0 / (fin ** 0.5)
        params["w" + name] = jax.random.uniform(
            kw, (fin, fout), jnp.float32, minval=-bound, maxval=bound)
        params["b" + name] = jax.random.uniform(
            kb, (1, fout), jnp.float32, minval=-bound, maxval=bound)
    return params


def reference_forward(x, params):
    """Pure-JAX fp32 reference mirroring the PyTorch forward."""
    px = jax.nn.relu(x @ params["wpi1"] + params["bpi1"])
    px = jax.nn.relu(px @ params["wpi2"] + params["bpi2"])
    logits = jax.nn.softmax(px @ params["wpi3"] + params["bpi3"], axis=-1)
    vx = jax.nn.relu(x @ params["wv1"] + params["bv1"])
    vx = jax.nn.relu(vx @ params["wv2"] + params["bv2"])
    values = vx @ params["wv3"] + params["bv3"]
    return values, logits


if __name__ == "__main__":
    key = jax.random.PRNGKey(0)
    B, s_dim, a_dim = 8, 32, 4

    key, kx = jax.random.split(key)
    x = jax.random.normal(kx, (B, s_dim), jnp.float32)
    params = init_params(key, s_dim, a_dim)
    packed = pack_params(params, a_dim)           # one-time host-side fusion

    values, logits = a3c_forward(x, packed)
    jax.block_until_ready((values, logits))

    v_ref, l_ref = reference_forward(x, params)
    assert values.shape == (B, 1) and logits.shape == (B, a_dim)
    # Tolerances relaxed vs the fp32 reference because the kernel runs the
    # native bf16 MXU path (f32 accumulation).
    assert jnp.allclose(values, v_ref, atol=5e-2, rtol=5e-2)
    assert jnp.allclose(logits, l_ref, atol=5e-2, rtol=5e-2)
    # approx reciprocal -> rows sum to 1 only approximately.
    assert jnp.allclose(jnp.sum(logits, axis=-1), 1.0, atol=1e-2)

    print("KERNEL_OK")
</pallas_src>

<mosaic_0001>
module attributes {stable_mosaic.version = 11 : i64} {
  func.func @a3c_fused_kernel(%arg0: memref<8x32xbf16, #tpu.memory_space<vmem>>, %arg1: memref<32x512xbf16, #tpu.memory_space<vmem>>, %arg2: memref<512x256xbf16, #tpu.memory_space<vmem>>, %arg3: memref<256x128xbf16, #tpu.memory_space<vmem>>, %arg4: memref<1x896xf32, #tpu.memory_space<vmem>>, %arg5: memref<8x128xf32, #tpu.memory_space<vmem>>) attributes {dimension_semantics = [], scalar_prefetch = 0 : i64, scratch_operands = 0 : i64, tpu.core_type = #tpu.core_type<tc>} {
    %c0 = arith.constant 0 : index
    %c0_0 = arith.constant 0 : index
    %0 = vector.load %arg4[%c0, %c0_0] : memref<1x896xf32, #tpu.memory_space<vmem>>, vector<1x512xf32>
    %c0_1 = arith.constant 0 : index
    %c512 = arith.constant 512 : index
    %1 = vector.load %arg4[%c0_1, %c512] : memref<1x896xf32, #tpu.memory_space<vmem>>, vector<1x256xf32>
    %c0_2 = arith.constant 0 : index
    %c768 = arith.constant 768 : index
    %2 = vector.load %arg4[%c0_2, %c768] : memref<1x896xf32, #tpu.memory_space<vmem>>, vector<1x128xf32>
    %c0_3 = arith.constant 0 : index
    %c0_4 = arith.constant 0 : index
    %3 = vector.load %arg0[%c0_3, %c0_4] : memref<8x32xbf16, #tpu.memory_space<vmem>>, vector<8x32xbf16>
    %c0_5 = arith.constant 0 : index
    %c0_6 = arith.constant 0 : index
    %4 = vector.load %arg1[%c0_5, %c0_6] : memref<32x512xbf16, #tpu.memory_space<vmem>>, vector<32x512xbf16>
    %cst = arith.constant dense<0.000000e+00> : vector<8x512xf32>
    %5 = tpu.matmul %3, %4, %cst {dimension_numbers = #tpu.dot_dimension_numbers<[1], [0], [0], [1], [0, 0, 1, 1], [], []>} : vector<8x32xbf16>, vector<32x512xbf16>, vector<8x512xf32> -> vector<8x512xf32>
    %6 = vector.broadcast %0 : vector<1x512xf32> to vector<8x512xf32>
    %7 = arith.addf %5, %6 : vector<8x512xf32>
    %cst_7 = arith.constant 0.000000e+00 : f32
    %8 = vector.broadcast %cst_7 : f32 to vector<8x512xf32>
    %9 = arith.maximumf %7, %8 : vector<8x512xf32>
    %10 = arith.truncf %9 : vector<8x512xf32> to vector<8x512xbf16>
    %c0_8 = arith.constant 0 : index
    %c0_9 = arith.constant 0 : index
    %11 = vector.load %arg2[%c0_8, %c0_9] : memref<512x256xbf16, #tpu.memory_space<vmem>>, vector<512x256xbf16>
    %cst_10 = arith.constant dense<0.000000e+00> : vector<8x256xf32>
    %12 = tpu.matmul %10, %11, %cst_10 {dimension_numbers = #tpu.dot_dimension_numbers<[1], [0], [0], [1], [0, 0, 1, 1], [], []>} : vector<8x512xbf16>, vector<512x256xbf16>, vector<8x256xf32> -> vector<8x256xf32>
    %13 = vector.broadcast %1 : vector<1x256xf32> to vector<8x256xf32>
    %14 = arith.addf %12, %13 : vector<8x256xf32>
    %cst_11 = arith.constant 0.000000e+00 : f32
    %15 = vector.broadcast %cst_11 : f32 to vector<8x256xf32>
    %16 = arith.maximumf %14, %15 : vector<8x256xf32>
    %17 = arith.truncf %16 : vector<8x256xf32> to vector<8x256xbf16>
    %c0_12 = arith.constant 0 : index
    %c0_13 = arith.constant 0 : index
    %18 = vector.load %arg3[%c0_12, %c0_13] : memref<256x128xbf16, #tpu.memory_space<vmem>>, vector<256x128xbf16>
    %cst_14 = arith.constant dense<0.000000e+00> : vector<8x128xf32>
    %19 = tpu.matmul %17, %18, %cst_14 {dimension_numbers = #tpu.dot_dimension_numbers<[1], [0], [0], [1], [0, 0, 1, 1], [], []>} : vector<8x256xbf16>, vector<256x128xbf16>, vector<8x128xf32> -> vector<8x128xf32>
    %20 = vector.broadcast %2 : vector<1x128xf32> to vector<8x128xf32>
    %21 = arith.addf %19, %20 : vector<8x128xf32>
    %22 = tpu.iota {dimensions = array<i32: 1>} : vector<8x128xi32>
    %c4_i32 = arith.constant 4 : i32
    %23 = vector.broadcast %c4_i32 : i32 to vector<8x128xi32>
    %24 = arith.cmpi slt, %22, %23 : vector<8x128xi32>
    %cst_15 = arith.constant 0xFF800000 : f32
    %25 = vector.broadcast %cst_15 : f32 to vector<8x128xf32>
    %26 = arith.select %24, %21, %25 : vector<8x128xi1>, vector<8x128xf32>
    %cst_16 = arith.constant dense<0xFF800000> : vector<8xf32>
    %27 = vector.multi_reduction <maximumf>, %26, %cst_16 [1] : vector<8x128xf32> to vector<8xf32>
    %28 = vector.shape_cast %27 : vector<8xf32> to vector<8x1xf32>
    %29 = vector.broadcast %28 : vector<8x1xf32> to vector<8x128xf32>
    %30 = arith.subf %26, %29 : vector<8x128xf32>
    %31 = math.exp %30 : vector<8x128xf32>
    %cst_17 = arith.constant dense<0.000000e+00> : vector<8xf32>
    %32 = vector.multi_reduction <add>, %31, %cst_17 [1] : vector<8x128xf32> to vector<8xf32>
    %33 = vector.shape_cast %32 : vector<8xf32> to vector<8x1xf32>
    %34 = tpu.reciprocal %33 {approx = true} : vector<8x1xf32> -> vector<8x1xf32>
    %35 = vector.broadcast %34 : vector<8x1xf32> to vector<8x128xf32>
    %36 = arith.mulf %31, %35 : vector<8x128xf32>
    %37 = arith.select %24, %36, %21 : vector<8x128xi1>, vector<8x128xf32>
    %c0_18 = arith.constant 0 : index
    %c0_19 = arith.constant 0 : index
    %38 = vector.load %arg5[%c0_18, %c0_19] : memref<8x128xf32, #tpu.memory_space<vmem>>, vector<8x128xf32>
    tpu.vector_store %arg5[%c0_18, %c0_19], %37 {strides = array<i32>} : memref<8x128xf32, #tpu.memory_space<vmem>>, vector<8x128xf32>,
    return
  }
}

</mosaic_0001>

<bundles_post_ra>
// kernel: tpu_custom_call.1
= control target key start
LH: loop header
LB: loop body
LE: loop exit
PB: predicated region body
PF: predicated region fallthrough
CT: control target
= control target key end

     0   :  { %10 = vsyncpa [#allocation3], 0  ;;  %s1435_s0 = inlined_call_operand.hbm [shape: bf16[8,32], index: 0, kind: input, shape index: {}]   ;;  %s1436_s1 = inlined_call_operand.hbm [shape: bf16[32,512], index: 1, kind: input, shape index: {}]   ;;  %s1437_s2 = inlined_call_operand.hbm [shape: bf16[512,256], index: 2, kind: input, shape index: {}]   ;;  %s1438_s3 = inlined_call_operand.hbm [shape: bf16[256,128], index: 3, kind: input, shape index: {}]   ;;  %s1439_s4 = inlined_call_operand.vmem [shape: f32[1,896], index: 4, kind: input, shape index: {}]   ;;  %s1440_s5 = inlined_call_operand.hbm [shape: f32[8,128], index: 5, kind: output, shape index: {}]  }
   0x1   :  { %11 = vsyncpa [#allocation6], 0 }
   0x2   :  { %12 = vsyncpa [#allocation9], 0 }
   0x3   :  { %13 = vsyncpa [#allocation4], 0  ;;  %s1304_s18 = smov [#allocation5]   ;;  %s1186_s22 = scalar_lea.hbm %s1436_s1, 1024 }
   0x4   :  { %s29_s19 = sshll.u32 %s1304_s18, 4  ;;  %p1187_p0 = scmp.ne.s32.totalorder %s1436_s1, %s1186_s22  ;;  %s30_s19 = int_to_ptr.vmem [resolvable:$true] %s29_s19 }
   0x5   :  { %p1190_p1 = scmp.lt.u32.totalorder %s1186_s22, %s1436_s1 }
   0x7   :  { %p1192_p2 = pnand %p1190_p1, %p1187_p0 }
   0x9   :  { %1195 = shalt.err (!%p1192_p2)
}
   0xa   :  { %s1196_s27 = scalar_lea.vmem %s30_s19, 1024  ;;  %p1201_p4 = scmp.lt.s32.totalorder %s30_s19, %s30_s19 }
   0xb   :  { %p1197_p3 = scmp.ne.s32.totalorder %s30_s19, %s1196_s27  ;;  %p1202_p5 = scmp.lt.s32.totalorder %s1196_s27, %s1196_s27 }
   0xd   :  { %p1203_p6 = por %p1202_p5, %p1201_p4 }
   0xf   :  { %p1204_p7 = pnand %p1203_p6, %p1197_p3 }
  0x11   :  { %1207 = shalt.err (!%p1204_p7)
}
  0x12   :  { %s1305_s28 = smov 256   ;;  %s1306_s29 = smov 16  }
  0x13   :  { %35 = dma.hbm_to_vmem [thread:$0]  %s1436_s1, 1024, %s30_s19, [#allocation6], %s1305_s28, %s1305_s28, %s1306_s29  }
  0x14   :  { %s1307_s7 = smov [#allocation2]   ;;  %s1308_s9 = smov [#allocation7]  }
  0x15   :  { %s20_s8 = sshll.u32 %s1307_s7, 4  ;;  %s41_s10 = sshll.u32 %s1308_s9, 4  ;;  %s21_s8 = int_to_ptr.vmem [resolvable:$true] %s20_s8  ;;  %s42_s10 = int_to_ptr.vmem [resolvable:$true] %s41_s10 }
  0x16   :  { %s1208_s13 = scalar_lea.hbm %s1435_s0, 64 }
  0x17   :  { %p1209_p8 = scmp.ne.s32.totalorder %s1435_s0, %s1208_s13  ;;  %p1212_p9 = scmp.lt.u32.totalorder %s1208_s13, %s1435_s0 }
  0x19   :  { %p1214_p10 = pnand %p1212_p9, %p1209_p8 }
  0x1b   :  { %1217 = shalt.err (!%p1214_p10)
}
  0x1c   :  { %s1218_s1 = scalar_lea.vmem %s21_s8, 64  ;;  %p1223_p12 = scmp.lt.s32.totalorder %s21_s8, %s21_s8 }
  0x1d   :  { %p1219_p11 = scmp.ne.s32.totalorder %s21_s8, %s1218_s1  ;;  %p1224_p13 = scmp.lt.s32.totalorder %s1218_s1, %s1218_s1 }
  0x1f   :  { %p1225_p0 = por %p1224_p13, %p1223_p12 }
  0x21   :  { %p1226_p1 = pnand %p1225_p0, %p1219_p11 }
  0x23   :  { %1229 = shalt.err (!%p1226_p1)
}
  0x24   :  { %23 = dma.hbm_to_vmem [thread:$0]  %s1435_s0, 64, %s21_s8, [#allocation3]  }
  0x25   :  { %s1230_s22 = scalar_lea.hbm %s1437_s2, 8192 }
  0x26   :  { %p1231_p2 = scmp.ne.s32.totalorder %s1437_s2, %s1230_s22  ;;  %p1234_p3 = scmp.lt.u32.totalorder %s1230_s22, %s1437_s2 }
  0x28   :  { %p1236_p4 = pnand %p1234_p3, %p1231_p2 }
  0x2a   :  { %1239 = shalt.err (!%p1236_p4)
}
  0x2b   :  { %s1240_s27 = scalar_lea.vmem %s42_s10, 8192  ;;  %p1245_p6 = scmp.lt.s32.totalorder %s42_s10, %s42_s10 }
  0x2c   :  { %p1241_p5 = scmp.ne.s32.totalorder %s42_s10, %s1240_s27  ;;  %p1246_p7 = scmp.lt.s32.totalorder %s1240_s27, %s1240_s27 }
  0x2e   :  { %p1247_p8 = por %p1246_p7, %p1245_p6 }
  0x30   :  { %p1248_p9 = pnand %p1247_p8, %p1241_p5 }
  0x32   :  { %1251 = shalt.err (!%p1248_p9)
}
  0x33   :  { %s1309_s0 = smov 128   ;;  %s1310_s28 = smov 8  }
  0x34   :  { %47 = dma.hbm_to_vmem [thread:$0]  %s1437_s2, 8192, %s42_s10, [#allocation6], %s1309_s0, %s1309_s0, %s1310_s28  }
  0x35   :  { %s1311_s6 = smov [#allocation8]   ;;  %s1252_s11 = scalar_lea.hbm %s1438_s3, 2048 }
  0x36   :  { %s53_s7 = sshll.u32 %s1311_s6, 4  ;;  %p1253_p10 = scmp.ne.s32.totalorder %s1438_s3, %s1252_s11  ;;  %s54_s7 = int_to_ptr.vmem [resolvable:$true] %s53_s7 }
  0x37   :  { %p1256_p11 = scmp.lt.u32.totalorder %s1252_s11, %s1438_s3 }
  0x39   :  { %p1258_p12 = pnand %p1256_p11, %p1253_p10 }
  0x3b   :  { %1261 = shalt.err (!%p1258_p12)
}
  0x3c   :  { %s1262_s16 = scalar_lea.vmem %s54_s7, 2048  ;;  %p1267_p0 = scmp.lt.s32.totalorder %s54_s7, %s54_s7 }
  0x3d   :  { %p1263_p13 = scmp.ne.s32.totalorder %s54_s7, %s1262_s16  ;;  %p1268_p1 = scmp.lt.s32.totalorder %s1262_s16, %s1262_s16 }
  0x3f   :  { %p1269_p2 = por %p1268_p1, %p1267_p0 }
  0x41   :  { %p1270_p3 = pnand %p1269_p2, %p1263_p13 }
  0x43   :  { %1273 = shalt.err (!%p1270_p3)
}
  0x44   :  { %s1312_s2 = smov 64   ;;  %s1313_s10 = smov 4  }
  0x45   :  { %59 = dma.hbm_to_vmem [thread:$0]  %s1438_s3, 2048, %s54_s7, [#allocation9], %s1312_s2, %s1312_s2, %s1313_s10  }
  0x46   :  { %1296 = dma.done.wait [#allocation3], 64  }
  0x47   :  { %1297 = vsyncadd [#allocation3], 4294967232 }
  0x48   :  { %1298 = dma.done.wait [#allocation6], 9216  }
  0x49   :  { %1299 = vsyncadd [#allocation6], 4294958080 }
  0x4a   :  { %1300 = dma.done.wait [#allocation9], 2048  }
  0x4b   :  { %1301 = vsyncadd [#allocation9], 4294965248  ;;  %v1314_v0 = vmov 0   ;;  %v1058_v1 = vld [vmem:[#allocation5 + $0x4] ss:$16 sps:$4 sm:$0xff]   ;;  %vm148_vm0 = vcmask 261120  }
  0x4c   :  { %184 = vmatprep.mubr.bf16.mxu0 %v1314_v0  ;;  %v1060_v2 = vld [vmem:[#allocation5] ss:$16 sps:$4 sm:$0xff]   ;;  %152 = vmatprep.subr.bf16.mxu0 %v1058_v1  ;;  %v1061_v3 = vld [vmem:[#allocation5 + $0x24] ss:$16 sps:$4 sm:$0xff]   ;;  %v1066_v5 = vld [vmem:[#allocation5 + $0xc] ss:$16 sps:$4 sm:$0xff]  }
  0x4d   :  { %153 = vmatpush1.bf16.msra.mxu0 %v1060_v2  ;;  %v1063_v4 = vld [vmem:[#allocation5 + $0x20] ss:$16 sps:$4 sm:$0xff]   ;;  %v78_v6 = vld [vmem:[#allocation2] sm:$0xf]  ;;  %v1064_v7 = vld [vmem:[#allocation5 + $0x8] ss:$16 sps:$4 sm:$0xff]  }
  0x4e   :  { %154 = vmatprep.subr.bf16.mxu0 %v1061_v3  ;;  %v1070_v8 = vld [vmem:[#allocation7 + $0x4] ss:$8 sps:$4 sm:$0xff]   ;;  %v1072_v9 = vld [vmem:[#allocation7] ss:$8 sps:$4 sm:$0xff]   ;;  %v1073_v10 = vld [vmem:[#allocation7 + $0x14] ss:$8 sps:$4 sm:$0xff]  }
  0x4f   :  { %v1069_v11 = vld [vmem:[#allocation5 + $0x2c] ss:$16 sps:$4 sm:$0xff]   ;;  %637 = vmatprep.subr.bf16.mxu1 %v1070_v8  ;;  %v1075_v12 = vld [vmem:[#allocation7 + $0x10] ss:$8 sps:$4 sm:$0xff]   ;;  %v1081_v16 = vld [vmem:[#allocation7 + $0x20] ss:$8 sps:$4 sm:$0xff]  }
  0x50   :  { %638 = vmatpush1.bf16.msra.mxu1 %v1072_v9  ;;  %v1076_v13 = vld [vmem:[#allocation7 + $0x24] ss:$8 sps:$4 sm:$0xff]   ;;  %v1067_v14 = vld [vmem:[#allocation5 + $0x28] ss:$16 sps:$4 sm:$0xff]   ;;  %v1082_v17 = vld [vmem:[#allocation7 + $0x34] ss:$8 sps:$4 sm:$0xff]  }
  0x51   :  { %155 = vmatpush1.bf16.msra.mxu0 %v1063_v4  ;;  %639 = vmatprep.subr.bf16.mxu1 %v1073_v10  ;;  %v1080_v15 = vld [vmem:[#allocation7 + $0x104] ss:$8 sps:$4 sm:$0xff]   ;;  %v1078_v18 = vld [vmem:[#allocation7 + $0x100] ss:$8 sps:$4 sm:$0xff]   ;;  %v1086_v19 = vld [vmem:[#allocation7 + $0x114] ss:$8 sps:$4 sm:$0xff]  }
  0x52   :  { %193 = vmatprep.subr.bf16.mxu0 %v1066_v5  ;;  %v1087_v20 = vld [vmem:[#allocation7 + $0x30] ss:$8 sps:$4 sm:$0xff]   ;;  %v1088_v21 = vld [vmem:[#allocation7 + $0x44] ss:$8 sps:$4 sm:$0xff]   ;;  %v1093_v24 = vld [vmem:[#allocation7 + $0x40] ss:$8 sps:$4 sm:$0xff]  }
  0x53   :  { %v1084_v22 = vld [vmem:[#allocation7 + $0x110] ss:$8 sps:$4 sm:$0xff]   ;;  %v1092_v23 = vld [vmem:[#allocation7 + $0x124] ss:$8 sps:$4 sm:$0xff]   ;;  %v1094_v25 = vld [vmem:[#allocation7 + $0x54] ss:$8 sps:$4 sm:$0xff]  }
  0x54   :  { %937 = vmatmul.mubr.msk.bf16.vlgmr.msra.gmra.mrb[0].mxu0 %vm148_vm0, %v78_v6  ;;  %640 = vmatpush1.bf16.msra.mxu1 %v1075_v12  ;;  %v1090_v26 = vld [vmem:[#allocation7 + $0x120] ss:$8 sps:$4 sm:$0xff]   ;;  %v1098_v27 = vld [vmem:[#allocation7 + $0x134] ss:$8 sps:$4 sm:$0xff]   ;;  %v1099_v28 = vld [vmem:[#allocation7 + $0x50] ss:$8 sps:$4 sm:$0xff]  }
  0x55   :  { %194 = vmatpush1.bf16.msra.mxu0 %v1064_v7  ;;  %225 = vmatprep.mubr.bf16.mxu0 %v1314_v0  ;;  %v1100_v29 = vld [vmem:[#allocation7 + $0x64] ss:$8 sps:$4 sm:$0xff]   ;;  %v1096_v30 = vld [vmem:[#allocation7 + $0x130] ss:$8 sps:$4 sm:$0xff]   ;;  %v1105_v32 = vld [vmem:[#allocation7 + $0x60] ss:$8 sps:$4 sm:$0xff]  }
  0x56   :  { %195 = vmatprep.subr.bf16.mxu0 %v1069_v11  ;;  %641 = vmatprep.subr.bf16.mxu1 %v1076_v13  ;;  %v1104_v31 = vld [vmem:[#allocation7 + $0x144] ss:$8 sps:$4 sm:$0xff]   ;;  %v1106_v33 = vld [vmem:[#allocation7 + $0x74] ss:$8 sps:$4 sm:$0xff]   ;;  %v1102_v34 = vld [vmem:[#allocation7 + $0x140] ss:$8 sps:$4 sm:$0xff]   ;;  %v88_v11 = vlaneseq }
  0x57   :  { %v1110_v35 = vld [vmem:[#allocation7 + $0x154] ss:$8 sps:$4 sm:$0xff]   ;;  %v1111_v36 = vld [vmem:[#allocation7 + $0x70] ss:$8 sps:$4 sm:$0xff]   ;;  %v1112_v37 = vld [vmem:[#allocation7 + $0x84] ss:$8 sps:$4 sm:$0xff]  }
  0x58   :  { %642 = vmatpush1.bf16.msra.mxu1 %v1081_v16  ;;  %v1108_v38 = vld [vmem:[#allocation7 + $0x150] ss:$8 sps:$4 sm:$0xff]   ;;  %v1116_v39 = vld [vmem:[#allocation7 + $0x164] ss:$8 sps:$4 sm:$0xff]   ;;  %v1117_v40 = vld [vmem:[#allocation7 + $0x80] ss:$8 sps:$4 sm:$0xff]  }
  0x59   :  { %196 = vmatpush1.bf16.msra.mxu0 %v1067_v14  ;;  %643 = vmatprep.subr.bf16.mxu1 %v1082_v17  ;;  %v1118_v41 = vld [vmem:[#allocation7 + $0x94] ss:$8 sps:$4 sm:$0xff]   ;;  %v1114_v42 = vld [vmem:[#allocation7 + $0x160] ss:$8 sps:$4 sm:$0xff]   ;;  %v1123_v44 = vld [vmem:[#allocation7 + $0x90] ss:$8 sps:$4 sm:$0xff]  }
  0x5a   :  { %678 = vmatprep.subr.bf16.mxu0 %v1080_v15  ;;  %v1122_v43 = vld [vmem:[#allocation7 + $0x174] ss:$8 sps:$4 sm:$0xff]   ;;  %v1124_v45 = vld [vmem:[#allocation7 + $0xa4] ss:$8 sps:$4 sm:$0xff]   ;;  %v1120_v46 = vld [vmem:[#allocation7 + $0x170] ss:$8 sps:$4 sm:$0xff]  }
  0x5b   :  { %v1128_v47 = vld [vmem:[#allocation7 + $0x184] ss:$8 sps:$4 sm:$0xff]   ;;  %v1129_v48 = vld [vmem:[#allocation7 + $0xa0] ss:$8 sps:$4 sm:$0xff]   ;;  %v1130_v49 = vld [vmem:[#allocation7 + $0xb4] ss:$8 sps:$4 sm:$0xff]  }
  0x5c   :  { %938 = vmatmul.mubr.msk.bf16.vlgmr.msra.gmra.mrb[4].mxu0 %vm148_vm0, %v78_v6  ;;  %644 = vmatpush1.bf16.msra.mxu1 %v1087_v20  ;;  %v1126_v50 = vld [vmem:[#allocation7 + $0x180] ss:$8 sps:$4 sm:$0xff]   ;;  %v1134_v51 = vld [vmem:[#allocation7 + $0x194] ss:$8 sps:$4 sm:$0xff]   ;;  %v1135_v52 = vld [vmem:[#allocation7 + $0xb0] ss:$8 sps:$4 sm:$0xff]  }
  0x5d   :  { %679 = vmatpush1.bf16.msra.mxu0 %v1078_v18  ;;  %645 = vmatprep.subr.bf16.mxu1 %v1088_v21  ;;  %v1136_v53 = vld [vmem:[#allocation7 + $0xc4] ss:$8 sps:$4 sm:$0xff]   ;;  %v1132_v54 = vld [vmem:[#allocation7 + $0x190] ss:$8 sps:$4 sm:$0xff]   ;;  %v1141_v56 = vld [vmem:[#allocation7 + $0xc0] ss:$8 sps:$4 sm:$0xff]  }
  0x5e   :  { %680 = vmatprep.subr.bf16.mxu0 %v1086_v19  ;;  %v1140_v55 = vld [vmem:[#allocation7 + $0x1a4] ss:$8 sps:$4 sm:$0xff]   ;;  %v1142_v57 = vld [vmem:[#allocation7 + $0xd4] ss:$8 sps:$4 sm:$0xff]   ;;  %v1138_v58 = vld [vmem:[#allocation7 + $0x1a0] ss:$8 sps:$4 sm:$0xff]  }
  0x5f   :  { %v1146_v59 = vld [vmem:[#allocation7 + $0x1b4] ss:$8 sps:$4 sm:$0xff]   ;;  %v1147_v60 = vld [vmem:[#allocation7 + $0xd0] ss:$8 sps:$4 sm:$0xff]   ;;  %v1148_v62 = vld [vmem:[#allocation7 + $0xe4] ss:$8 sps:$4 sm:$0xff]  }
  0x60   :  { %646 = vmatpush1.bf16.msra.mxu1 %v1093_v24  ;;  %v1144_v61 = vld [vmem:[#allocation7 + $0x1b0] ss:$8 sps:$4 sm:$0xff]   ;;  %v1152_v63 = vld [vmem:[#allocation7 + $0x1c4] ss:$8 sps:$4 sm:$0xff]   ;;  %v1150_v0 = vld [vmem:[#allocation7 + $0x1c0] ss:$8 sps:$4 sm:$0xff]  }
  0x61   :  { %681 = vmatpush1.bf16.msra.mxu0 %v1084_v22  ;;  %647 = vmatprep.subr.bf16.mxu1 %v1094_v25  ;;  %v1153_v1 = vld [vmem:[#allocation7 + $0xe0] ss:$8 sps:$4 sm:$0xff]   ;;  %v1154_v2 = vld [vmem:[#allocation7 + $0xf4] ss:$8 sps:$4 sm:$0xff]   ;;  %v1156_v4 = vld [vmem:[#allocation7 + $0x1d0] ss:$8 sps:$4 sm:$0xff]  }
  0x62   :  { %682 = vmatprep.subr.bf16.mxu0 %v1092_v23  ;;  %v1158_v3 = vld [vmem:[#allocation7 + $0x1d4] ss:$8 sps:$4 sm:$0xff]   ;;  %v1159_v5 = vld [vmem:[#allocation7 + $0xf0] ss:$8 sps:$4 sm:$0xff]   ;;  %v1162_v6 = vld [vmem:[#allocation7 + $0x1e4] ss:$8 sps:$4 sm:$0xff]  }
  0x63   :  { %v1160_v7 = vld [vmem:[#allocation7 + $0x1e0] ss:$8 sps:$4 sm:$0xff]   ;;  %v1165_v8 = vld [vmem:[#allocation7 + $0x1f4] ss:$8 sps:$4 sm:$0xff]   ;;  %v1163_v9 = vld [vmem:[#allocation7 + $0x1f0] ss:$8 sps:$4 sm:$0xff]  }
  0x64   :  { %648 = vmatpush1.bf16.msra.mxu1 %v1099_v28  ;;  %v1166_v10 = vld [vmem:[#allocation8 + $0x40] sm:$0xff]   ;;  %v1397_v12 = vshrl.u32 %v88_v11, 7  ;;  %v75_v14 = vld [vmem:[%s1439_s4] sm:$0xf]  ;;  %s1315_s23 = smov [#allocation10]  }
  0x65   :  { %683 = vmatpush1.bf16.msra.mxu0 %v1090_v26  ;;  %649 = vmatprep.subr.bf16.mxu1 %v1100_v29  ;;  %s918_s24 = sshll.u32 %s1315_s23, 4  ;;  %s919_s24 = int_to_ptr.vmem [resolvable:$true] %s918_s24 }
  0x66   :  { %684 = vmatprep.subr.bf16.mxu0 %v1098_v27  ;;  %v90_v13 = vsub.s32 0, %v1397_v12  ;;  %v94_v15 = vsub.s32 1, %v1397_v12  ;;  %v98_v21 = vsub.s32 2, %v1397_v12  ;;  %v102_v24 = vsub.s32 3, %v1397_v12  ;;  %v1003_v12 = vld [vmem:[%s1439_s4 + $0x6] ss:$0 sm:$0xff]  ;;  %p1279_p5 = scmp.lt.s32.totalorder %s919_s24, %s919_s24 }
  0x68   :  { %650 = vmatpush1.bf16.msra.mxu1 %v1105_v32  ;;  %v91_v16 = vrot.slane %v75_v14, %v90_v13  ;;  %v95_v17 = vrot.slane %v75_v14, %v94_v15  ;;  %v99_v28 = vrot.slane %v75_v14, %v98_v21 }
  0x69   :  { %685 = vmatpush1.bf16.msra.mxu0 %v1096_v30  ;;  %651 = vmatprep.subr.bf16.mxu1 %v1106_v33  ;;  %v103_v30 = vrot.slane %v75_v14, %v102_v24  ;;  %v1168_v33 = vld [vmem:[#allocation8 + $0x48] sm:$0xff]  }
  0x6a   :  { %686 = vmatprep.subr.bf16.mxu0 %v1104_v31  ;;  %v1167_v31 = vld [vmem:[#allocation8] sm:$0xff]  }
  0x6c   :  { %652 = vmatpush1.bf16.msra.mxu1 %v1111_v36 }
  0x6d   :  { %687 = vmatpush1.bf16.msra.mxu0 %v1102_v34  ;;  %653 = vmatprep.subr.bf16.mxu1 %v1112_v37 }
  0x6e   :  { %688 = vmatprep.subr.bf16.mxu0 %v1110_v35 }
  0x70   :  { %654 = vmatpush1.bf16.msra.mxu1 %v1117_v40 }
  0x71   :  { %689 = vmatpush1.bf16.msra.mxu0 %v1108_v38  ;;  %655 = vmatprep.subr.bf16.mxu1 %v1118_v41 }
  0x72   :  { %690 = vmatprep.subr.bf16.mxu0 %v1116_v39  ;;  %v1169_v39 = vld [vmem:[#allocation8 + $0x8] sm:$0xff]  }
  0x74   :  { %656 = vmatpush1.bf16.msra.mxu1 %v1123_v44 }
  0x75   :  { %691 = vmatpush1.bf16.msra.mxu0 %v1114_v42  ;;  %657 = vmatprep.subr.bf16.mxu1 %v1124_v45  ;;  %v1170_v42 = vld [vmem:[#allocation8 + $0x50] sm:$0xff]  }
  0x76   :  { %692 = vmatprep.subr.bf16.mxu0 %v1122_v43  ;;  %v1171_v45 = vld [vmem:[#allocation8 + $0x10] sm:$0xff]  }
  0x78   :  { %658 = vmatpush1.bf16.msra.mxu1 %v1129_v48  ;;  %v1173_v48 = vld [vmem:[#allocation8 + $0x18] sm:$0xff]  }
  0x79   :  { %693 = vmatpush1.bf16.msra.mxu0 %v1120_v46  ;;  %659 = vmatprep.subr.bf16.mxu1 %v1130_v49  ;;  %v1174_v49 = vld [vmem:[#allocation8 + $0x60] sm:$0xff]  }
  0x7a   :  { %694 = vmatprep.subr.bf16.mxu0 %v1128_v47  ;;  %v1172_v47 = vld [vmem:[#allocation8 + $0x58] sm:$0xff]  }
  0x7c   :  { %660 = vmatpush1.bf16.msra.mxu1 %v1135_v52  ;;  %v1177_v52 = vld [vmem:[#allocation8 + $0x28] sm:$0xff]  }
  0x7d   :  { %695 = vmatpush1.bf16.msra.mxu0 %v1126_v50  ;;  %661 = vmatprep.subr.bf16.mxu1 %v1136_v53  ;;  %v1175_v50 = vld [vmem:[#allocation8 + $0x20] sm:$0xff]   ;;  %v1178_v53 = vld [vmem:[#allocation8 + $0x70] sm:$0xff]  }
  0x7e   :  { %696 = vmatprep.subr.bf16.mxu0 %v1134_v51  ;;  %v1176_v51 = vld [vmem:[#allocation8 + $0x68] sm:$0xff]  }
  0x80   :  { %662 = vmatpush1.bf16.msra.mxu1 %v1141_v56  ;;  %v1181_v56 = vld [vmem:[#allocation8 + $0x38] sm:$0xff]  }
  0x81   :  { %697 = vmatpush1.bf16.msra.mxu0 %v1132_v54  ;;  %663 = vmatprep.subr.bf16.mxu1 %v1142_v57  ;;  %v1179_v54 = vld [vmem:[#allocation8 + $0x30] sm:$0xff]   ;;  %v76_v57 = vld [vmem:[%s1439_s4 + $0x4] sm:$0x3]  ;;  %s1274_s4 = scalar_lea.vmem %s919_s24, 128 }
  0x82   :  { %698 = vmatprep.subr.bf16.mxu0 %v1140_v55  ;;  %v1180_v55 = vld [vmem:[#allocation8 + $0x78] sm:$0xff]   ;;  %p1275_p4 = scmp.ne.s32.totalorder %s919_s24, %s1274_s4  ;;  %p1280_p6 = scmp.lt.s32.totalorder %s1274_s4, %s1274_s4 }
  0x84   :  { %664 = vmatpush1.bf16.msra.mxu1 %v1147_v60  ;;  %p1281_p7 = por %p1280_p6, %p1279_p5 }
  0x85   :  { %699 = vmatpush1.bf16.msra.mxu0 %v1138_v58  ;;  %665 = vmatprep.subr.bf16.mxu1 %v1148_v62 }
  0x86   :  { %700 = vmatprep.subr.bf16.mxu0 %v1146_v59  ;;  %p1282_p8 = pnand %p1281_p7, %p1275_p4 }
  0x88   :  { %666 = vmatpush1.bf16.msra.mxu1 %v1153_v1 }
  0x89   :  { %701 = vmatpush1.bf16.msra.mxu0 %v1144_v61  ;;  %667 = vmatprep.subr.bf16.mxu1 %v1154_v2  ;;  %v310_v61 = vrot.slane %v76_v57, %v90_v13  ;;  %v898_v13 = vand.u32 127, %v88_v11 }
  0x8a   :  { %702 = vmatprep.subr.bf16.mxu0 %v1152_v63  ;;  %v314_v63 = vrot.slane %v76_v57, %v94_v15 }
  0x8b   :  { %vm899_vm1 = vcmp.lt.s32.totalorder %v898_v13, 4 }
  0x8c   :  { %668 = vmatpush1.bf16.msra.mxu1 %v1159_v5 }
  0x8d   :  { %703 = vmatpush1.bf16.msra.mxu0 %v1150_v0  ;;  %1020 = vmatprep.subr.bf16.mxu1 %v1166_v10 }
  0x8e   :  { %704 = vmatprep.subr.bf16.mxu0 %v1158_v3 }
  0x91   :  { %705 = vmatpush1.bf16.msra.mxu0 %v1156_v4 }
  0x92   :  { %706 = vmatprep.subr.bf16.mxu0 %v1162_v6 }
  0x95   :  { %707 = vmatpush1.bf16.msra.mxu0 %v1160_v7 }
  0x96   :  { %708 = vmatprep.subr.bf16.mxu0 %v1165_v8 }
  0x99   :  { %709 = vmatpush1.bf16.msra.mxu0 %v1163_v9 }
 0x127   :  { %v186_v18 = vpop.f32.mrb[0].mxu0 }
 0x128   :  { %v187_v19 = vadd.f32 %v186_v18, %v91_v16  ;;  %v188_v20 = vpop.f32.mrb[1].mxu0 }
 0x129   :  { %v189_v22 = vadd.f32 %v188_v20, %v95_v17  ;;  %v190_v23 = vpop.f32.mrb[2].mxu0 }
 0x12a   :  { %v234_v25 = vmax.f32 %v187_v19, 0.0  ;;  %v191_v26 = vpop.f32.mrb[3].mxu0 }
 0x12b   :  { %v235_v27 = vmax.f32 %v189_v22, 0.0 }
 0x12c   :  { %v238_v32 = vpack.c.bf16 %v234_v25, %v234_v25 }
 0x12d   :  { %v239_v29 = vpack.c.bf16 %v235_v27, %v235_v27 }
 0x12f   :  { %v227_v34 = vpop.f32.mrb[4].mxu0  ;;  %669 = vmatprep.mubr.bf16.mxu1 %v239_v29 }
 0x130   :  { %v228_v35 = vadd.f32 %v227_v34, %v99_v28  ;;  %v229_v36 = vpop.f32.mrb[5].mxu0  ;;  %670 = vmatmul.mubr.bf16.vlgmr.msra.gmra.mrb[0].mxu1 %v238_v32 }
 0x131   :  { %v230_v37 = vadd.f32 %v229_v36, %v103_v30  ;;  %v231_v38 = vpop.f32.mrb[6].mxu0  ;;  %1021 = vmatpush3.bf16.msra.mxu1 %v1167_v31 }
 0x132   :  { %v236_v40 = vmax.f32 %v228_v35, 0.0  ;;  %v232_v41 = vpop.f32.mrb[7].mxu0  ;;  %1022 = vmatprep.subr.bf16.mxu1 %v1168_v33 }
 0x133   :  { %v237_v43 = vmax.f32 %v230_v37, 0.0 }
 0x134   :  { %v240_v46 = vpack.c.bf16 %v236_v40, %v236_v40 }
 0x135   :  { %v241_v44 = vpack.c.bf16 %v237_v43, %v237_v43  ;;  %1023 = vmatpush3.bf16.msra.mxu1 %v1169_v39 }
 0x136   :  { %1024 = vmatprep.subr.bf16.mxu1 %v1170_v42 }
 0x137   :  { %710 = vmatprep.mubr.bf16.mxu0 %v241_v44 }
 0x138   :  { %711 = vmatmul.mubr.bf16.vlgmr.msra.gmra.mrb[8].mxu0 %v240_v46 }
 0x139   :  { %1025 = vmatpush3.bf16.msra.mxu1 %v1171_v45 }
 0x13a   :  { %1026 = vmatprep.subr.bf16.mxu1 %v1172_v47 }
 0x13d   :  { %1027 = vmatpush3.bf16.msra.mxu1 %v1173_v48 }
 0x13e   :  { %1028 = vmatprep.subr.bf16.mxu1 %v1174_v49 }
 0x141   :  { %1029 = vmatpush3.bf16.msra.mxu1 %v1175_v50 }
 0x142   :  { %1030 = vmatprep.subr.bf16.mxu1 %v1176_v51 }
 0x145   :  { %1031 = vmatpush3.bf16.msra.mxu1 %v1177_v52 }
 0x146   :  { %1032 = vmatprep.subr.bf16.mxu1 %v1178_v53 }
 0x149   :  { %1033 = vmatpush3.bf16.msra.mxu1 %v1179_v54 }
 0x14a   :  { %1034 = vmatprep.subr.bf16.mxu1 %v1180_v55 }
 0x14d   :  { %1035 = vmatpush3.bf16.msra.mxu1 %v1181_v56 }
 0x203   :  { %v671_v58 = vpop.f32.mrb[0].mxu1 }
 0x204   :  { %v673_v59 = vpop.f32.mrb[1].mxu1  ;;  %v672_v0 = vadd.f32 %v671_v58, %v310_v61 }
 0x205   :  { %v675_v60 = vpop.f32.mrb[2].mxu1  ;;  %v674_v1 = vadd.f32 %v673_v59, %v314_v63 }
 0x206   :  { %v676_v62 = vpop.f32.mrb[3].mxu1 }
 0x20b   :  { %v712_v2 = vpop.f32.mrb[8].mxu0 }
 0x20c   :  { %v713_v3 = vadd.f32 %v712_v2, %v672_v0  ;;  %v714_v4 = vpop.f32.mrb[9].mxu0 }
 0x20d   :  { %v715_v5 = vadd.f32 %v714_v4, %v674_v1  ;;  %v716_v6 = vpop.f32.mrb[10].mxu0 }
 0x20e   :  { %v719_v7 = vmax.f32 %v713_v3, 0.0  ;;  %v717_v8 = vpop.f32.mrb[11].mxu0 }
 0x20f   :  { %v720_v9 = vmax.f32 %v715_v5, 0.0 }
 0x210   :  { %v721_v14 = vpack.c.bf16 %v719_v7, %v719_v7 }
 0x211   :  { %v722_v10 = vpack.c.bf16 %v720_v9, %v720_v9 }
 0x213   :  { %889 = vmatprep.mubr.bf16.mxu1 %v722_v10 }
 0x214   :  { %890 = vmatmul.mubr.bf16.vlgmr.msra.gmra.mrb[4].mxu1 %v721_v14 }
 0x2e7   :  { %v1036_v16 = vpop.f32.mrb[4].mxu1 }
 0x2e8   :  { %v1037_v17 = vpop.f32.mrb[5].mxu1 }
 0x2e9   :  { %v1038_v15 = vadd.f32 %v1037_v17, %v1036_v16  ;;  %v1039_v18 = vpop.f32.mrb[6].mxu1 }
 0x2ea   :  { %v1040_v19 = vpop.f32.mrb[7].mxu1 }
 0x2eb   :  { %v892_v20 = vadd.f32 %v1038_v15, %v1003_v12 }
 0x2ed   :  { %v900_v21 = vsel %vm899_vm1, %v892_v20, -inf }
 0x2ee   :  { %901 = vmax.xlane.f32.xlu0 %v900_v21 }
 0x37b   :  { %v902_v22 = vpop.xlane.xlu0 %901 }
 0x37c   :  { %v903_v23 = vsub.f32 %v900_v21, %v902_v22 }
 0x37e   :  { %v904_v24 = vmul.f32 1.442695, %v903_v23 }
 0x380   :  { %1182 = vpow2.f32 %v904_v24 }
 0x38a   :  { %v1183_v25 = vpop.eup %1182 }
 0x38b   :  { %906 = vadd.xlane.f32.xlu0 %v1183_v25 }
 0x418   :  { %v907_v11 = vpop.xlane.xlu0 %906 }
 0x419   :  { %1184 = vrcp.f32 %v907_v11 }
 0x423   :  { %v1185_v26 = vpop.eup %1184 }
 0x424   :  { %v909_v27 = vmul.f32 %v1185_v26, %v1183_v25 }
 0x426   :  { %v910_v28 = vsel %vm899_vm1, %v909_v27, %v892_v20 }
 0x427   :  { %911 = vst [vmem:[#allocation10] sm:$0xff] %v910_v28 }
 0x428   :  { %1285 = shalt.err (!%p1282_p8)
}
 0x429   :  { %s1286_s27 = scalar_lea.hbm %s1440_s5, 128 }
 0x42a   :  { %p1287_p9 = scmp.ne.s32.totalorder %s1440_s5, %s1286_s27  ;;  %p1290_p10 = scmp.lt.u32.totalorder %s1286_s27, %s1440_s5 }
 0x42c   :  { %p1292_p11 = pnand %p1290_p10, %p1287_p9 }
 0x42e   :  { %1295 = shalt.err (!%p1292_p11)
}
 0x42f   :  { %921 = dma.vmem_to_hbm [thread:$0]  %s919_s24, 128, %s1440_s5, [#allocation4]  }
 0x430   :  { %1302 = dma.done.wait [#allocation4], 128  }
 0x431   :  { %1303 = vsyncadd [#allocation4], 4294967168 }
 0x432   :  { %925 = vsyncpa [#allocation3], 1 }
 0x433   :  { %926 = vsyncpa [#allocation6], 1 }
 0x434   :  { %927 = vsyncpa [#allocation9], 1 }
 0x435   :  { %928 = vsyncpa [#allocation4], 1 }

</bundles_post_ra>
